<compile_context>
chip_gen: v7x
topology: tpu7x:2x2x1
jax: 0.10.0
libtpu: 0.0.40
codegen_flags: <defaults>
</compile_context>

<pallas_src>
import math

import jax
import jax.numpy as jnp
from jax import lax
from jax.experimental import pallas as pl
from jax.experimental.pallas import tpu as pltpu


def _make_mrsa_kernel(num_heads, num_edge_type, scale_inv, compute_dtype,
                      write_attn):
    """Kernel body. Ref shapes per grid step (b, qi) (batch dim squeezed):

      w_ref    : SMEM [E, H]       per-edge/head weights, pre-scaled by 1/sqrt(D)
      q_ref    : VMEM [H, tq, D]   compute_dtype
      k_ref    : VMEM [H, N,  D]
      v_ref    : VMEM [H, N,  D]
      a_ref    : VMEM [E, tq, N]   adjacency rows for this query tile
      out_ref  : VMEM [H, tq, D]
      attn_ref : VMEM [H, tq, N]   (only if write_attn)
    """

    def kernel(w_ref, q_ref, k_ref, v_ref, a_ref, out_ref, *rest):
        attn_ref = rest[0] if write_attn else None

        def head_body(h, carry):
            q_h = q_ref[h]                         # (tq, D)
            k_h = k_ref[h]                         # (N,  D)
            v_h = v_ref[h]                         # (N,  D)

            # attn_score = Q @ K^T : contract last dims (no explicit transpose),
            # native (bf16) operands on the MXU, f32 accumulation.
            s = lax.dot_general(
                q_h, k_h,
                dimension_numbers=(((1,), (1,)), ((), ())),
                preferred_element_type=jnp.float32,
            )                                      # (tq, N) f32

            # Folded edge bias, computed in the adjacency dtype (bf16 default):
            #   comb = sum_t A_t * (w[t, h] / sqrt(D))
            comb = a_ref[0] * w_ref[0, h].astype(a_ref.dtype)
            for t in range(1, num_edge_type):
                comb = comb + a_ref[t] * w_ref[t, h].astype(a_ref.dtype)
            s = s * (comb.astype(jnp.float32) + scale_inv)

            # Numerically-stable softmax; exact reciprocal (only over a (tq, 1)
            # column) so attention rows sum to 1.
            m = jnp.max(s, axis=-1, keepdims=True)
            e = jnp.exp(s - m)
            inv = pl.reciprocal(jnp.sum(e, axis=-1, keepdims=True), approx=False)
            p = e * inv                            # (tq, N) f32

            if write_attn:
                attn_ref[h] = p.astype(attn_ref.dtype)

            # dropout(p=0.0) is the identity; out = P @ V (MXU, bf16 operands).
            out_ref[h] = jnp.dot(
                p.astype(compute_dtype), v_h, preferred_element_type=jnp.float32
            ).astype(out_ref.dtype)
            return carry

        lax.fori_loop(0, num_heads, head_body, 0,
                      unroll=2 if num_heads % 2 == 0 else 1)

    return kernel


def _vmem_capacity_bytes():
    try:
        info = pltpu.get_tpu_info()
        return int(getattr(info, "vmem_capacity_bytes", 64 * 2**20))
    except Exception:
        return 64 * 2**20          # conservative (v7x-sized) fallback


def _block_bytes(tq, N, H, D, E, qkv_isize, a_isize, out_isize, attn_isize,
                 write_attn, kv_buffers):
    q_blk = 2 * H * tq * D * qkv_isize                 # double-buffered
    kv_blk = 2 * kv_buffers * H * N * D * qkv_isize    # K + V
    a_blk = 2 * E * tq * N * a_isize
    o_blk = 2 * H * tq * D * out_isize
    attn_blk = 2 * H * tq * N * attn_isize if write_attn else 0
    tmp = 6 * tq * N * 4                               # live f32 temporaries
    return q_blk + kv_blk + a_blk + o_blk + attn_blk + tmp


def multi_relational_self_attention(
    Q, K, V, adjacency, weight_E,
    attention_mask=None,
    return_attn_weight=True,
    block_q=None,
    compute_dtype=jnp.bfloat16,
    adjacency_dtype=jnp.bfloat16,
    attn_dtype=jnp.bfloat16,
    out_dtype=None,
):
    """Pallas TPU implementation of MultiRelationalSelfAttention.forward.

    Q, K, V    : [B, H, N, D]
    adjacency  : pre-packed [B, E, N, N] array (preferred), or a list of E
                 [B, N, N] matrices (packed here; costs an extra HBM pass).
    weight_E   : [E, H]  (the E nn.Parameters of shape (1, H, 1, 1), flattened)
    Returns {'out': [B,H,N,D]} plus {'attn_weight': [B,H,N,N]} when requested.

    Notes:
      * attn_weight is emitted in `attn_dtype` (bf16 default): it is the
        dominant HBM writeback. Pass jnp.float32 if full precision is needed.
      * adjacency is cast to `adjacency_dtype` (bf16 default, exact for binary
        0/1 adjacency). Pass adjacency_dtype=None for weighted graphs.
    """
    # TODO(synk): attention_mask path (utils.mask_attention_score) lives
    # outside the module source; only the mask=None path is implemented.
    assert attention_mask is None

    B, H, N, D = Q.shape
    if out_dtype is None:
        out_dtype = Q.dtype
    if compute_dtype is None:
        compute_dtype = Q.dtype
    Qc, Kc, Vc = (x.astype(compute_dtype) for x in (Q, K, V))

    if isinstance(adjacency, (list, tuple)):
        # Prefer packing once outside the hot path; this is an extra HBM pass.
        A = jnp.stack([jnp.asarray(a) for a in adjacency], axis=1)
    else:
        A = jnp.asarray(adjacency)
    if adjacency_dtype is not None:
        A = A.astype(adjacency_dtype)
    E = A.shape[1]
    assert E > 0 and A.shape == (B, E, N, N)

    scale_inv = 1.0 / math.sqrt(float(D))
    w = jnp.asarray(weight_E, dtype=jnp.float32).reshape(E, H) * scale_inv

    # --- K/V specs: single-buffered (their block index only changes with b).
    kv_map = lambda b, qi: (b, 0, 0, 0)
    kv_shape = (None, H, N, D)
    kv_buffers = 1
    try:
        k_spec = pl.BlockSpec(kv_shape, kv_map, pipeline_mode=pl.Buffered(1))
        v_spec = pl.BlockSpec(kv_shape, kv_map, pipeline_mode=pl.Buffered(1))
    except Exception:  # jax without BlockSpec.pipeline_mode -> default 2 bufs
        kv_buffers = 2
        k_spec = pl.BlockSpec(kv_shape, kv_map)
        v_spec = pl.BlockSpec(kv_shape, kv_map)

    # --- VMEM-aware query-tile selection.
    qkv_isize = jnp.dtype(compute_dtype).itemsize
    a_isize = jnp.dtype(A.dtype).itemsize
    out_isize = jnp.dtype(out_dtype).itemsize
    attn_isize = jnp.dtype(attn_dtype).itemsize
    vmem_cap = _vmem_capacity_bytes()
    budget = 0.85 * (vmem_cap - 8 * 2**20)

    def _bytes(tq):
        return _block_bytes(tq, N, H, D, E, qkv_isize, a_isize, out_isize,
                            attn_isize, return_attn_weight, kv_buffers)

    if block_q is not None:
        tq = block_q
    else:
        tq = None
        for cand in (512, 256, 128, 64, 32, 16, 8):
            if N % cand == 0 and _bytes(cand) <= budget:
                tq = cand
                break
        if tq is None:
            for cand in (128, 64, 32, 16, 8):
                if N % cand == 0:
                    tq = cand
                    break
        if tq is None:
            tq = N                 # small / irregular N: one full-extent tile
    assert N % tq == 0
    nq = N // tq
    # TODO(synk): for very long N (K/V no longer fit VMEM) add a flash-style
    # third grid axis over key tiles with online-softmax m/l/acc scratch.

    est = _bytes(tq)
    cap_hr = vmem_cap - 8 * 2**20            # leave compiler-scratch headroom
    vmem_limit = int(min(cap_hr, max(32 * 2**20, est + 4 * 2**20)))

    kernel = _make_mrsa_kernel(H, E, scale_inv, compute_dtype,
                               return_attn_weight)

    out_shapes = [jax.ShapeDtypeStruct((B, H, N, D), out_dtype)]
    out_specs = [pl.BlockSpec((None, H, tq, D), lambda b, qi: (b, 0, qi, 0))]
    if return_attn_weight:
        out_shapes.append(jax.ShapeDtypeStruct((B, H, N, N), attn_dtype))
        out_specs.append(
            pl.BlockSpec((None, H, tq, N), lambda b, qi: (b, 0, qi, 0)))

    # Advisory cost estimate so XLA schedules surrounding ops sensibly.
    flops = 4 * B * H * N * N * D + B * H * N * N * (2 * E + 6)
    attn_bytes = B * H * N * N * attn_isize if return_attn_weight else 0
    bytes_accessed = (3 * B * H * N * D * qkv_isize + B * E * N * N * a_isize
                      + E * H * 4 + B * H * N * D * out_isize + attn_bytes)
    cost = pl.CostEstimate(flops=int(flops),
                           transcendentals=int(B * H * N * N),
                           bytes_accessed=int(bytes_accessed))

    results = pl.pallas_call(
        kernel,
        out_shape=tuple(out_shapes),
        grid_spec=pltpu.PrefetchScalarGridSpec(
            num_scalar_prefetch=0,
            grid=(B, nq),
            in_specs=[
                pl.BlockSpec(memory_space=pltpu.MemorySpace.SMEM),             # w
                pl.BlockSpec((None, H, tq, D), lambda b, qi: (b, 0, qi, 0)),   # Q
                k_spec,                                                        # K
                v_spec,                                                        # V
                pl.BlockSpec((None, E, tq, N), lambda b, qi: (b, 0, qi, 0)),   # A
            ],
            out_specs=out_specs,
        ),
        compiler_params=pltpu.CompilerParams(
            dimension_semantics=("parallel", "parallel"),
            vmem_limit_bytes=vmem_limit,
        ),
        cost_estimate=cost,
    )(w, Qc, Kc, Vc, A)

    if return_attn_weight:
        out, attn = results
        return {"out": out, "attn_weight": attn}
    (out,) = results
    return {"out": out}


def _reference(Q, K, V, A_list, weight_E):
    """Pure-JAX reference mirroring the PyTorch forward (mask=None, dropout=0)."""
    s = jnp.einsum("bhnd,bhmd->bhnm", Q, K)
    b_e = jnp.zeros_like(s)
    for typ, A in enumerate(A_list):
        w_typ = weight_E[typ].reshape(1, -1, 1, 1)        # (1, H, 1, 1)
        b_e = b_e + s * (A[:, None, :, :].astype(s.dtype) * w_typ)
    s = (s + b_e) / (Q.shape[-1] ** 0.5)
    p = jax.nn.softmax(s, axis=-1)
    return jnp.einsum("bhnm,bhmd->bhnd", p, V), p


def _run_case(seed, B, H, N, D, E, tol):
    key = jax.random.PRNGKey(seed)
    kq, kk, kv, ka, kw = jax.random.split(key, 5)

    # Moderate-magnitude Q/K keep the softmax away from hard saturation so the
    # bf16-vs-f32 comparison below stays meaningful.
    Q = 0.5 * jax.random.normal(kq, (B, H, N, D), dtype=jnp.float32)
    K = 0.5 * jax.random.normal(kk, (B, H, N, D), dtype=jnp.float32)
    V = jax.random.normal(kv, (B, H, N, D), dtype=jnp.float32)

    # Binary adjacency matrix per edge type, shape [B, N, N]
    A_list = [
        (jax.random.uniform(k_, (B, N, N)) > 0.5).astype(jnp.float32)
        for k_ in jax.random.split(ka, E)
    ]
    # Preferred calling convention: adjacency packed once, outside the hot path.
    A_packed = jnp.stack(A_list, axis=1).astype(jnp.bfloat16)

    # Glorot init for weight_E (shape (1, H, 1, 1) per edge type):
    # stdv = sqrt(6 / (size(-2) + size(-1))) = sqrt(3)
    stdv = math.sqrt(3.0)
    weight_E = jax.random.uniform(kw, (E, H), dtype=jnp.float32,
                                  minval=-stdv, maxval=stdv)

    res = multi_relational_self_attention(Q, K, V, A_packed, weight_E)
    jax.block_until_ready(res)

    # Reference computed in f32 on the same bf16-rounded Q/K/V the kernel
    # consumes, so the comparison isolates kernel error from input rounding.
    Qr, Kr, Vr = (x.astype(jnp.bfloat16).astype(jnp.float32) for x in (Q, K, V))
    ref_out, ref_attn = _reference(Qr, Kr, Vr, A_list, weight_E)

    out = res["out"].astype(jnp.float32)
    attn = res["attn_weight"].astype(jnp.float32)
    assert jnp.allclose(out, ref_out, rtol=tol, atol=tol), (
        f"out mismatch: max abs err {jnp.max(jnp.abs(out - ref_out))}")
    assert jnp.allclose(attn, ref_attn, rtol=tol, atol=tol), (
        f"attn mismatch: max abs err {jnp.max(jnp.abs(attn - ref_attn))}")


if __name__ == "__main__":
    # Small shape consistent with the module's forward.
    _run_case(seed=0, B=2, H=2, N=8, D=32, E=2, tol=2e-2)
    # Slightly larger shape exercising query tiling and the multi-head loop.
    _run_case(seed=1, B=1, H=4, N=256, D=64, E=3, tol=2e-2)
    print("KERNEL_OK")
</pallas_src>

<mosaic_0001>
module attributes {stable_mosaic.version = 11 : i64} {
  func.func @kernel(%arg0: i32, %arg1: i32, %arg2: memref<2x2xf32, #tpu.memory_space<smem>>, %arg3: memref<1x2x8x32xbf16, #tpu.memory_space<vmem>>, %arg4: memref<1x2x8x32xbf16, #tpu.memory_space<vmem>>, %arg5: memref<1x2x8x32xbf16, #tpu.memory_space<vmem>>, %arg6: memref<1x2x8x8xbf16, #tpu.memory_space<vmem>>, %arg7: memref<1x2x8x32xf32, #tpu.memory_space<vmem>>, %arg8: memref<1x2x8x8xbf16, #tpu.memory_space<vmem>>) attributes {dimension_semantics = [#tpu.dimension_semantics<parallel>, #tpu.dimension_semantics<parallel>], iteration_bounds = array<i64: 2, 1>, scalar_prefetch = 0 : i64, scratch_operands = 0 : i64, tpu.core_type = #tpu.core_type<tc>, window_params = [{transform_indices = @transform_0, window_bounds = array<i64: 2, 2>}, {transform_indices = @transform_1, window_bounds = array<i64: 1, 2, 8, 32>}, {pipeline_mode = #tpu.pipeline_mode<synchronous>, transform_indices = @transform_2, window_bounds = array<i64: 1, 2, 8, 32>}, {pipeline_mode = #tpu.pipeline_mode<synchronous>, transform_indices = @transform_3, window_bounds = array<i64: 1, 2, 8, 32>}, {transform_indices = @transform_4, window_bounds = array<i64: 1, 2, 8, 8>}, {transform_indices = @transform_5, window_bounds = array<i64: 1, 2, 8, 32>}, {transform_indices = @transform_6, window_bounds = array<i64: 1, 2, 8, 8>}]} {
    %c0_i32 = arith.constant 0 : i32
    %c0 = arith.constant 0 : index
    %0 = arith.index_cast %c0_i32 : i32 to index
    %c0_0 = arith.constant 0 : index
    %c0_1 = arith.constant 0 : index
    %1 = vector.load %arg3[%c0, %0, %c0_0, %c0_1] : memref<1x2x8x32xbf16, #tpu.memory_space<vmem>>, vector<1x1x8x32xbf16>
    %2 = vector.shape_cast %1 : vector<1x1x8x32xbf16> to vector<8x32xbf16>
    %c0_2 = arith.constant 0 : index
    %3 = arith.index_cast %c0_i32 : i32 to index
    %c0_3 = arith.constant 0 : index
    %c0_4 = arith.constant 0 : index
    %4 = vector.load %arg4[%c0_2, %3, %c0_3, %c0_4] : memref<1x2x8x32xbf16, #tpu.memory_space<vmem>>, vector<1x1x8x32xbf16>
    %5 = vector.shape_cast %4 : vector<1x1x8x32xbf16> to vector<8x32xbf16>
    %c0_5 = arith.constant 0 : index
    %6 = arith.index_cast %c0_i32 : i32 to index
    %c0_6 = arith.constant 0 : index
    %c0_7 = arith.constant 0 : index
    %7 = vector.load %arg5[%c0_5, %6, %c0_6, %c0_7] : memref<1x2x8x32xbf16, #tpu.memory_space<vmem>>, vector<1x1x8x32xbf16>
    %8 = vector.shape_cast %7 : vector<1x1x8x32xbf16> to vector<8x32xbf16>
    %cst = arith.constant dense<0.000000e+00> : vector<8x8xf32>
    %9 = tpu.matmul %2, %5, %cst {dimension_numbers = #tpu.dot_dimension_numbers<[1], [1], [0], [0], [0, 0, 1, 0], [], []>} : vector<8x32xbf16>, vector<8x32xbf16>, vector<8x8xf32> -> vector<8x8xf32>
    %c0_8 = arith.constant 0 : index
    %c0_9 = arith.constant 0 : index
    %c0_10 = arith.constant 0 : index
    %c0_11 = arith.constant 0 : index
    %10 = vector.load %arg6[%c0_8, %c0_9, %c0_10, %c0_11] : memref<1x2x8x8xbf16, #tpu.memory_space<vmem>>, vector<1x1x8x8xbf16>
    %11 = vector.shape_cast %10 : vector<1x1x8x8xbf16> to vector<8x8xbf16>
    %c0_12 = arith.constant 0 : index
    %12 = arith.index_cast %c0_i32 : i32 to index
    %13 = memref.load %arg2[%c0_12, %12] : memref<2x2xf32, #tpu.memory_space<smem>>
    %14 = arith.truncf %13 : f32 to bf16
    %15 = vector.broadcast %14 : bf16 to vector<8x8xbf16>
    %16 = arith.mulf %11, %15 : vector<8x8xbf16>
    %c0_13 = arith.constant 0 : index
    %c1 = arith.constant 1 : index
    %c0_14 = arith.constant 0 : index
    %c0_15 = arith.constant 0 : index
    %17 = vector.load %arg6[%c0_13, %c1, %c0_14, %c0_15] : memref<1x2x8x8xbf16, #tpu.memory_space<vmem>>, vector<1x1x8x8xbf16>
    %18 = vector.shape_cast %17 : vector<1x1x8x8xbf16> to vector<8x8xbf16>
    %c1_16 = arith.constant 1 : index
    %19 = arith.index_cast %c0_i32 : i32 to index
    %20 = memref.load %arg2[%c1_16, %19] : memref<2x2xf32, #tpu.memory_space<smem>>
    %21 = arith.truncf %20 : f32 to bf16
    %22 = vector.broadcast %21 : bf16 to vector<8x8xbf16>
    %23 = arith.mulf %18, %22 : vector<8x8xbf16>
    %24 = arith.addf %16, %23 : vector<8x8xbf16>
    %25 = arith.extf %24 : vector<8x8xbf16> to vector<8x8xf32>
    %cst_17 = arith.constant 0.176776692 : f32
    %26 = vector.broadcast %cst_17 : f32 to vector<8x8xf32>
    %27 = arith.addf %25, %26 : vector<8x8xf32>
    %28 = arith.mulf %9, %27 : vector<8x8xf32>
    %cst_18 = arith.constant dense<0xFF800000> : vector<8xf32>
    %29 = vector.multi_reduction <maximumf>, %28, %cst_18 [1] : vector<8x8xf32> to vector<8xf32>
    %30 = vector.shape_cast %29 : vector<8xf32> to vector<8x1xf32>
    %31 = vector.broadcast %30 : vector<8x1xf32> to vector<8x8xf32>
    %32 = arith.subf %28, %31 : vector<8x8xf32>
    %33 = math.exp %32 : vector<8x8xf32>
    %cst_19 = arith.constant dense<0.000000e+00> : vector<8xf32>
    %34 = vector.multi_reduction <add>, %33, %cst_19 [1] : vector<8x8xf32> to vector<8xf32>
    %35 = vector.shape_cast %34 : vector<8xf32> to vector<8x1xf32>
    %36 = tpu.reciprocal %35 : vector<8x1xf32> -> vector<8x1xf32>
    %37 = vector.broadcast %36 : vector<8x1xf32> to vector<8x8xf32>
    %38 = arith.mulf %33, %37 : vector<8x8xf32>
    %39 = arith.truncf %38 : vector<8x8xf32> to vector<8x8xbf16>
    %c0_20 = arith.constant 0 : index
    %40 = arith.index_cast %c0_i32 : i32 to index
    %c0_21 = arith.constant 0 : index
    %c0_22 = arith.constant 0 : index
    %41 = vector.load %arg8[%c0_20, %40, %c0_21, %c0_22] : memref<1x2x8x8xbf16, #tpu.memory_space<vmem>>, vector<1x1x8x8xbf16>
    %42 = vector.shape_cast %41 : vector<1x1x8x8xbf16> to vector<8x8xbf16>
    %43 = vector.shape_cast %39 : vector<8x8xbf16> to vector<1x1x8x8xbf16>
    tpu.vector_store %arg8[%c0_20, %40, %c0_21, %c0_22], %43 {strides = array<i32>} : memref<1x2x8x8xbf16, #tpu.memory_space<vmem>>, vector<1x1x8x8xbf16>,
    %44 = arith.truncf %38 : vector<8x8xf32> to vector<8x8xbf16>
    %cst_23 = arith.constant dense<0.000000e+00> : vector<8x32xf32>
    %45 = tpu.matmul %44, %8, %cst_23 {dimension_numbers = #tpu.dot_dimension_numbers<[1], [0], [0], [1], [0, 0, 1, 1], [], []>} : vector<8x8xbf16>, vector<8x32xbf16>, vector<8x32xf32> -> vector<8x32xf32>
    %c0_24 = arith.constant 0 : index
    %46 = arith.index_cast %c0_i32 : i32 to index
    %c0_25 = arith.constant 0 : index
    %c0_26 = arith.constant 0 : index
    %47 = vector.load %arg7[%c0_24, %46, %c0_25, %c0_26] : memref<1x2x8x32xf32, #tpu.memory_space<vmem>>, vector<1x1x8x32xf32>
    %48 = vector.shape_cast %47 : vector<1x1x8x32xf32> to vector<8x32xf32>
    %49 = vector.shape_cast %45 : vector<8x32xf32> to vector<1x1x8x32xf32>
    tpu.vector_store %arg7[%c0_24, %46, %c0_25, %c0_26], %49 {strides = array<i32>} : memref<1x2x8x32xf32, #tpu.memory_space<vmem>>, vector<1x1x8x32xf32>,
    %c1_i32 = arith.constant 1 : i32
    %c0_27 = arith.constant 0 : index
    %50 = arith.index_cast %c1_i32 : i32 to index
    %c0_28 = arith.constant 0 : index
    %c0_29 = arith.constant 0 : index
    %51 = vector.load %arg3[%c0_27, %50, %c0_28, %c0_29] : memref<1x2x8x32xbf16, #tpu.memory_space<vmem>>, vector<1x1x8x32xbf16>
    %52 = vector.shape_cast %51 : vector<1x1x8x32xbf16> to vector<8x32xbf16>
    %c0_30 = arith.constant 0 : index
    %53 = arith.index_cast %c1_i32 : i32 to index
    %c0_31 = arith.constant 0 : index
    %c0_32 = arith.constant 0 : index
    %54 = vector.load %arg4[%c0_30, %53, %c0_31, %c0_32] : memref<1x2x8x32xbf16, #tpu.memory_space<vmem>>, vector<1x1x8x32xbf16>
    %55 = vector.shape_cast %54 : vector<1x1x8x32xbf16> to vector<8x32xbf16>
    %c0_33 = arith.constant 0 : index
    %56 = arith.index_cast %c1_i32 : i32 to index
    %c0_34 = arith.constant 0 : index
    %c0_35 = arith.constant 0 : index
    %57 = vector.load %arg5[%c0_33, %56, %c0_34, %c0_35] : memref<1x2x8x32xbf16, #tpu.memory_space<vmem>>, vector<1x1x8x32xbf16>
    %58 = vector.shape_cast %57 : vector<1x1x8x32xbf16> to vector<8x32xbf16>
    %cst_36 = arith.constant dense<0.000000e+00> : vector<8x8xf32>
    %59 = tpu.matmul %52, %55, %cst_36 {dimension_numbers = #tpu.dot_dimension_numbers<[1], [1], [0], [0], [0, 0, 1, 0], [], []>} : vector<8x32xbf16>, vector<8x32xbf16>, vector<8x8xf32> -> vector<8x8xf32>
    %c0_37 = arith.constant 0 : index
    %c0_38 = arith.constant 0 : index
    %c0_39 = arith.constant 0 : index
    %c0_40 = arith.constant 0 : index
    %60 = vector.load %arg6[%c0_37, %c0_38, %c0_39, %c0_40] : memref<1x2x8x8xbf16, #tpu.memory_space<vmem>>, vector<1x1x8x8xbf16>
    %61 = vector.shape_cast %60 : vector<1x1x8x8xbf16> to vector<8x8xbf16>
    %c0_41 = arith.constant 0 : index
    %62 = arith.index_cast %c1_i32 : i32 to index
    %63 = memref.load %arg2[%c0_41, %62] : memref<2x2xf32, #tpu.memory_space<smem>>
    %64 = arith.truncf %63 : f32 to bf16
    %65 = vector.broadcast %64 : bf16 to vector<8x8xbf16>
    %66 = arith.mulf %61, %65 : vector<8x8xbf16>
    %c0_42 = arith.constant 0 : index
    %c1_43 = arith.constant 1 : index
    %c0_44 = arith.constant 0 : index
    %c0_45 = arith.constant 0 : index
    %67 = vector.load %arg6[%c0_42, %c1_43, %c0_44, %c0_45] : memref<1x2x8x8xbf16, #tpu.memory_space<vmem>>, vector<1x1x8x8xbf16>
    %68 = vector.shape_cast %67 : vector<1x1x8x8xbf16> to vector<8x8xbf16>
    %c1_46 = arith.constant 1 : index
    %69 = arith.index_cast %c1_i32 : i32 to index
    %70 = memref.load %arg2[%c1_46, %69] : memref<2x2xf32, #tpu.memory_space<smem>>
    %71 = arith.truncf %70 : f32 to bf16
    %72 = vector.broadcast %71 : bf16 to vector<8x8xbf16>
    %73 = arith.mulf %68, %72 : vector<8x8xbf16>
    %74 = arith.addf %66, %73 : vector<8x8xbf16>
    %75 = arith.extf %74 : vector<8x8xbf16> to vector<8x8xf32>
    %cst_47 = arith.constant 0.176776692 : f32
    %76 = vector.broadcast %cst_47 : f32 to vector<8x8xf32>
    %77 = arith.addf %75, %76 : vector<8x8xf32>
    %78 = arith.mulf %59, %77 : vector<8x8xf32>
    %cst_48 = arith.constant dense<0xFF800000> : vector<8xf32>
    %79 = vector.multi_reduction <maximumf>, %78, %cst_48 [1] : vector<8x8xf32> to vector<8xf32>
    %80 = vector.shape_cast %79 : vector<8xf32> to vector<8x1xf32>
    %81 = vector.broadcast %80 : vector<8x1xf32> to vector<8x8xf32>
    %82 = arith.subf %78, %81 : vector<8x8xf32>
    %83 = math.exp %82 : vector<8x8xf32>
    %cst_49 = arith.constant dense<0.000000e+00> : vector<8xf32>
    %84 = vector.multi_reduction <add>, %83, %cst_49 [1] : vector<8x8xf32> to vector<8xf32>
    %85 = vector.shape_cast %84 : vector<8xf32> to vector<8x1xf32>
    %86 = tpu.reciprocal %85 : vector<8x1xf32> -> vector<8x1xf32>
    %87 = vector.broadcast %86 : vector<8x1xf32> to vector<8x8xf32>
    %88 = arith.mulf %83, %87 : vector<8x8xf32>
    %89 = arith.truncf %88 : vector<8x8xf32> to vector<8x8xbf16>
    %c0_50 = arith.constant 0 : index
    %90 = arith.index_cast %c1_i32 : i32 to index
    %c0_51 = arith.constant 0 : index
    %c0_52 = arith.constant 0 : index
    %91 = vector.load %arg8[%c0_50, %90, %c0_51, %c0_52] : memref<1x2x8x8xbf16, #tpu.memory_space<vmem>>, vector<1x1x8x8xbf16>
    %92 = vector.shape_cast %91 : vector<1x1x8x8xbf16> to vector<8x8xbf16>
    %93 = vector.shape_cast %89 : vector<8x8xbf16> to vector<1x1x8x8xbf16>
    tpu.vector_store %arg8[%c0_50, %90, %c0_51, %c0_52], %93 {strides = array<i32>} : memref<1x2x8x8xbf16, #tpu.memory_space<vmem>>, vector<1x1x8x8xbf16>,
    %94 = arith.truncf %88 : vector<8x8xf32> to vector<8x8xbf16>
    %cst_53 = arith.constant dense<0.000000e+00> : vector<8x32xf32>
    %95 = tpu.matmul %94, %58, %cst_53 {dimension_numbers = #tpu.dot_dimension_numbers<[1], [0], [0], [1], [0, 0, 1, 1], [], []>} : vector<8x8xbf16>, vector<8x32xbf16>, vector<8x32xf32> -> vector<8x32xf32>
    %c0_54 = arith.constant 0 : index
    %96 = arith.index_cast %c1_i32 : i32 to index
    %c0_55 = arith.constant 0 : index
    %c0_56 = arith.constant 0 : index
    %97 = vector.load %arg7[%c0_54, %96, %c0_55, %c0_56] : memref<1x2x8x32xf32, #tpu.memory_space<vmem>>, vector<1x1x8x32xf32>
    %98 = vector.shape_cast %97 : vector<1x1x8x32xf32> to vector<8x32xf32>
    %99 = vector.shape_cast %95 : vector<8x32xf32> to vector<1x1x8x32xf32>
    tpu.vector_store %arg7[%c0_54, %96, %c0_55, %c0_56], %99 {strides = array<i32>} : memref<1x2x8x32xf32, #tpu.memory_space<vmem>>, vector<1x1x8x32xf32>,
    %c2_i32 = arith.constant 2 : i32
    return
  }
  func.func @transform_0(%arg0: i32, %arg1: i32) -> (i32, i32) {
    %c0_i32 = arith.constant 0 : i32
    %c0_i32_0 = arith.constant 0 : i32
    %c0_i32_1 = arith.constant 0 : i32
    return %c0_i32, %c0_i32_0 : i32, i32
  }
  func.func @transform_1(%arg0: i32, %arg1: i32) -> (i32, i32, i32, i32) {
    %c0_i32 = arith.constant 0 : i32
    %c0_i32_0 = arith.constant 0 : i32
    %c0_i32_1 = arith.constant 0 : i32
    return %arg0, %c0_i32, %arg1, %c0_i32_0 : i32, i32, i32, i32
  }
  func.func @transform_2(%arg0: i32, %arg1: i32) -> (i32, i32, i32, i32) {
    %c0_i32 = arith.constant 0 : i32
    %c0_i32_0 = arith.constant 0 : i32
    %c0_i32_1 = arith.constant 0 : i32
    %c0_i32_2 = arith.constant 0 : i32
    return %arg0, %c0_i32, %c0_i32_0, %c0_i32_1 : i32, i32, i32, i32
  }
  func.func @transform_3(%arg0: i32, %arg1: i32) -> (i32, i32, i32, i32) {
    %c0_i32 = arith.constant 0 : i32
    %c0_i32_0 = arith.constant 0 : i32
    %c0_i32_1 = arith.constant 0 : i32
    %c0_i32_2 = arith.constant 0 : i32
    return %arg0, %c0_i32, %c0_i32_0, %c0_i32_1 : i32, i32, i32, i32
  }
  func.func @transform_4(%arg0: i32, %arg1: i32) -> (i32, i32, i32, i32) {
    %c0_i32 = arith.constant 0 : i32
    %c0_i32_0 = arith.constant 0 : i32
    %c0_i32_1 = arith.constant 0 : i32
    return %arg0, %c0_i32, %arg1, %c0_i32_0 : i32, i32, i32, i32
  }
  func.func @transform_5(%arg0: i32, %arg1: i32) -> (i32, i32, i32, i32) {
    %c0_i32 = arith.constant 0 : i32
    %c0_i32_0 = arith.constant 0 : i32
    %c0_i32_1 = arith.constant 0 : i32
    return %arg0, %c0_i32, %arg1, %c0_i32_0 : i32, i32, i32, i32
  }
  func.func @transform_6(%arg0: i32, %arg1: i32) -> (i32, i32, i32, i32) {
    %c0_i32 = arith.constant 0 : i32
    %c0_i32_0 = arith.constant 0 : i32
    %c0_i32_1 = arith.constant 0 : i32
    return %arg0, %c0_i32, %arg1, %c0_i32_0 : i32, i32, i32, i32
  }
}

</mosaic_0001>

<bundles_post_ra>
// kernel: tpu_custom_call.1
= control target key start
LH: loop header
LB: loop body
LE: loop exit
PB: predicated region body
PF: predicated region fallthrough
CT: control target
= control target key end

     0   :  { %s1854_s0 = inlined_call_operand.hbm [shape: f32[2,2], index: 0, kind: input, shape index: {}]   ;;  %s1855_s1 = inlined_call_operand.hbm [shape: bf16[2,2,8,32], index: 1, kind: input, shape index: {}]   ;;  %s1856_s2 = inlined_call_operand.hbm [shape: bf16[2,2,8,32], index: 2, kind: input, shape index: {}]   ;;  %s1857_s3 = inlined_call_operand.hbm [shape: bf16[2,2,8,32], index: 3, kind: input, shape index: {}]   ;;  %s1858_s4 = inlined_call_operand.hbm [shape: bf16[2,2,8,8], index: 4, kind: input, shape index: {}]   ;;  %s1859_s5 = inlined_call_operand.hbm [shape: f32[2,2,8,32], index: 5, kind: output, shape index: {0}]   ;;  %s1860_s6 = inlined_call_operand.hbm [shape: bf16[2,2,8,8], index: 6, kind: output, shape index: {1}]  }
   0x1   :  { %1873 = sst [smem:[#allocation24_spill]] %s1854_s0 }
   0x2   :  { %1874 = sst [smem:[#allocation25_spill]] %s1855_s1 }
   0x3   :  { %1875 = sst [smem:[#allocation26_spill]] %s1856_s2 }
   0x4   :  { %1876 = sst [smem:[#allocation27_spill]] %s1857_s3 }
   0x5   :  { %1877 = sst [smem:[#allocation28_spill]] %s1858_s4 }
   0x6   :  { %12 = vsyncpa [#allocation5], 0 }
   0x7   :  { %13 = vsyncpa [#allocation3], 0 }
   0x8   :  { %15 = vsyncpa [#allocation3 + $0x1], 0 }
   0x9   :  { %16 = vsyncpa [#allocation8], 0 }
   0xa   :  { %17 = vsyncpa [#allocation11], 0 }
   0xb   :  { %19 = vsyncpa [#allocation11 + $0x1], 0 }
   0xc   :  { %20 = vsyncpa [#allocation4], 0 }
   0xd   :  { %22 = vsyncpa [#allocation4 + $0x1], 0 }
   0xe   :  { %23 = vsyncpa [#allocation14], 0 }
   0xf   :  { %25 = vsyncpa [#allocation14 + $0x1], 0  ;;  %s1422_s21 = smov 0   ;;  %s1424_s22 = smov 0  }
  0x10   :  { %s1426_s23 = smov 0   ;;  %s1428_s24 = smov 0  }
  0x11   :  { %s1430_s25 = smov 0   ;;  %s1432_s26 = smov 0  }
  0x12 LB: > { %1878 = sst [smem:[#allocation21_spill]] %s1350_s21  ;;  %s921_s27 = sadd.s32 4294967295, %s1370_s26   ;;  %s1370_s26 = sphi %s1432_s26, %s31_s26   ;;  %s1366_s25 = sphi %s1430_s25, %s1913_s25   ;;  %s1362_s24 = sphi %s1428_s24, %s1912_s24   ;;  %s1358_s23 = sphi %s1426_s23, %s1911_s23   ;;  %s1354_s22 = sphi %s1424_s22, %s1910_s22   ;;  %s1350_s21 = sphi %s1422_s21, %s1909_s21  }
  0x13   : > { %s922_s28 = sadd.s32 4294967294, %s1370_s26   ;;  %p86_p0 = scmp.ne.s32.totalorder %s1354_s22, %s1350_s21 }
  0x14   : > { %p1456_p1 = scmp.eq.s32.totalorder %s921_s27, 0  ;;  %p1460_p2 = scmp.eq.s32.totalorder %s921_s27, 1 }
  0x15   : > { %p198_p3 = scmp.eq.s32.totalorder %s922_s28, 1  ;;  %p923_p5 = scmp.ge.s32.totalorder %s1370_s26, 1 }
  0x16   : > { %s1879_s29 = scalar_select %p1456_p1, 1, 0 }
  0x17   : > { %s1880_s30 = scalar_select %p1460_p2, 1, 0 }
  0x18   : > { %p1466_p4 = por %p1456_p1, %p86_p0  ;;  %p1471_p6 = por %p198_p3, %p86_p0 }
  0x19   : > { %p233_p7 = scmp.lt.s32.totalorder %s1370_s26, 3  ;;  %s1477_s9 = sshll.u32 %s1362_s24, 7 }
  0x1a   : > { %s1881_s7 = scalar_select %p1466_p4, 1, 0 }
  0x1b   : > { %s1882_s8 = scalar_select %p1471_p6, 1, 0 }
  0x1c   : > { %p1479_p8 = pnand %p923_p5, %p233_p7  ;;  %s1885_s2 = sld [smem:[#allocation26_spill]] }
  0x1d   : > { %1883 = sst [smem:[#allocation22_spill]] %s1882_s8  ;;  %s1372_s14 = smov [#allocation7]  }
  0x1e   : > { %s1884_s10 = scalar_select %p1479_p8, 1, 0 }
  0x1f   : > { %p1016_p9 = pneg %p1479_p8  ;;  %s257_s15 = sshll.u32 %s1372_s14, 4  ;;  %s1491_s15 = int_to_ptr.vmem [resolvable:$true] %s257_s15 }
  0x20   : > { %s1887_s3 = sld [smem:[#allocation27_spill]] }
  0x21   : > { %p1495_p10 = pnand %p1016_p9, %p1466_p4  ;;  %p1508_p12 = pnand %p1016_p9, %p1456_p1 }
  0x22   : > { %s1487_s13 = scalar_lea.hbm %s1885_s2, %s1477_s9  ;;  %s1116_s12 = scalar_lea.hbm %s1885_s2, 256 }
  0x23   : > { %s1888_s20 = scalar_select %p1508_p12, 1, 0 }
  0x24   : > { %s1111_s27 = scalar_lea.hbm %s1487_s13, 128  ;;  %p1113_p0 = pneg %p1495_p10 }
  0x25   : > { %p1112_p13 = scmp.ne.s32.totalorder %s1487_s13, %s1111_s27  ;;  %p1117_p7 = scmp.lt.u32.totalorder %s1487_s13, %s1885_s2 }
  0x26   : > { %s1503_s19 = scalar_lea.hbm %s1887_s3, %s1477_s9  ;;  %p1118_p9 = scmp.lt.u32.totalorder %s1116_s12, %s1111_s27 }
  0x27   : > { %p1114_p3 = pnand %p1113_p0, %p1112_p13  ;;  %p1120_p6 = scmp.lt.u32.totalorder %s1111_s27, %s1487_s13 }
  0x28   : > { %p1119_p11 = por %p1118_p9, %p1117_p7 }
  0x29   : > { %p1115_p5 = pneg %p1114_p3 }
  0x2a   : > { %p1121_p4 = por %p1120_p6, %p1119_p11 }
  0x2c   : > { %p1122_p1 = pnand %p1121_p4, %p1115_p5 }
  0x2e   : > { %1125 = shalt.err (!%p1122_p1)
}
  0x2f   : > { %s1126_s18 = scalar_lea.vmem %s1491_s15, 128  ;;  %p1134_p2 = scmp.lt.s32.totalorder %s1491_s15, %s1491_s15 }
  0x30   : > { %p1127_p13 = scmp.ne.s32.totalorder %s1491_s15, %s1126_s18  ;;  %p1135_p12 = scmp.lt.s32.totalorder %s1126_s18, %s1126_s18 }
  0x32   : > { %p1129_p3 = pnand %p1127_p13, %p1113_p0  ;;  %p1136_p7 = por %p1135_p12, %p1134_p2 }
  0x34   : > { %p1130_p8 = pneg %p1129_p3 }
  0x36   : > { %p1137_p9 = pnand %p1136_p7, %p1130_p8 }
  0x38   : > { %1140 = shalt.err (!%p1137_p9)
}
  0x39   : > { %s1373_s27 = smov 64   ;;  %s1374_s28 = smov 4  }
  0x3a   : > { %1022 = dma.hbm_to_vmem [thread:$0]  (!%p1495_p10), %s1487_s13, 128, %s1491_s15, [#allocation8], %s1373_s27, %s1373_s27, %s1374_s28  }
  0x3b   : > { %s1889_s0 = sld [smem:[#allocation24_spill]]  ;;  %p1890_p2 = scmp.ne.s32.totalorder %s1888_s20, 0 }
  0x3d   : > { %p1143_p4 = pneg %p1890_p2 }
  0x41   : > { %s1141_s14 = scalar_lea.hbm %s1889_s0, 32 }
  0x42   : > { %p1142_p1 = scmp.ne.s32.totalorder %s1889_s0, %s1141_s14  ;;  %p1148_p11 = scmp.lt.u32.totalorder %s1141_s14, %s1889_s0 }
  0x44   : > { %p1144_p6 = pnand %p1143_p4, %p1142_p1 }
  0x46   : > { %p1145_p8 = pneg %p1144_p6 }
  0x48   : > { %p1150_p12 = pnand %p1148_p11, %p1145_p8 }
  0x4a   : > { %1153 = shalt.err (!%p1150_p12)
}
  0x4b   : > { %s1375_s21 = smov [#allocation2]   ;;  %s1376_s11 = smov [#allocation9]  }
  0x4c   : > { %1019 = dma.hbm_to_smem (!%p1890_p2), %s1889_s0, 32, %s1375_s21, [#allocation5]  }
  0x4d   : > { %s273_s12 = sshll.u32 %s1376_s11, 4  ;;  %s1154_s17 = scalar_lea.hbm %s1503_s19, 128  ;;  %s274_s12 = int_to_ptr.vmem [resolvable:$true] %s273_s12 }
  0x4e   : > { %p1155_p5 = scmp.ne.s32.totalorder %s1503_s19, %s1154_s17  ;;  %s1159_s20 = scalar_lea.hbm %s1887_s3, 256 }
  0x4f   : > { %p1160_p7 = scmp.lt.u32.totalorder %s1503_s19, %s1887_s3  ;;  %p1161_p9 = scmp.lt.u32.totalorder %s1159_s20, %s1154_s17 }
  0x50   : > { %p1157_p13 = pnand %p1155_p5, %p1113_p0  ;;  %p1163_p2 = scmp.lt.u32.totalorder %s1154_s17, %s1503_s19 }
  0x51   : > { %p1162_p1 = por %p1161_p9, %p1160_p7 }
  0x52   : > { %p1158_p3 = pneg %p1157_p13 }
  0x53   : > { %p1164_p4 = por %p1163_p2, %p1162_p1 }
  0x55   : > { %p1165_p6 = pnand %p1164_p4, %p1158_p3 }
  0x57   : > { %1168 = shalt.err (!%p1165_p6)
}
  0x58   : > { %s1169_s21 = scalar_lea.vmem %s274_s12, 128  ;;  %p1177_p5 = scmp.lt.s32.totalorder %s274_s12, %s274_s12 }
  0x59   : > { %p1170_p8 = scmp.ne.s32.totalorder %s274_s12, %s1169_s21  ;;  %p1178_p13 = scmp.lt.s32.totalorder %s1169_s21, %s1169_s21 }
  0x5b   : > { %p1172_p11 = pnand %p1170_p8, %p1113_p0  ;;  %p1179_p7 = por %p1178_p13, %p1177_p5 }
  0x5d   : > { %p1173_p12 = pneg %p1172_p11 }
  0x5f   : > { %p1180_p9 = pnand %p1179_p7, %p1173_p12 }
  0x61   : > { %1183 = shalt.err (!%p1180_p9)
}
  0x62   : > { %1025 = dma.hbm_to_vmem [thread:$0]  (!%p1495_p10), %s1503_s19, 128, %s274_s12, [#allocation8], %s1373_s27, %s1373_s27, %s1374_s28  }
  0x63   : > { %s43_s13 = sadd.s32 1, %s1366_s25  ;;  %s73_s15 = sadd.s32 1, %s1358_s23 }
  0x64   : > { %p45_p0 = scmp.ge.s32.totalorder %s43_s13, 2  ;;  %p80_p3 = scmp.ne.s32.totalorder %s1358_s23, %s1354_s22 }
  0x65   : > { %p81_p1 = scmp.eq.s32.totalorder %s1370_s26, 0  ;;  %p1041_p2 = scmp.lt.s32.totalorder %s1370_s26, 2 }
  0x66   : > { %s1915_s13 = smov (%p45_p0, %s43_s13), 0  ;;  %p1892_p6 = scmp.ne.s32.totalorder %s1880_s30, 0 }
  0x67   : > { %1891 = sst [smem:[#allocation23_spill]] %s1915_s13  ;;  %p82_p4 = por %p81_p1, %p80_p3 }
  0x68   : > { %p1589_p8 = por %p1892_p6, %p80_p3  ;;  %s68_s11 = ssub.s32 %s1366_s25, %s1915_s13 }
  0x69   : > { %s1596_s17 = sand.u32 1, %s1358_s23   ;;  %p71_p10 = scmp.eq.s32.totalorder %s68_s11, 0 }
  0x6a   : > { %s1869_s19 = sshll.u32 %s1596_s17, 3  ;;  %s1870_s12 = sshll.u32 %s1366_s25, 7 }
  0x6b   : > { %s1601_s2 = scalar_select %p71_p10, %s1358_s23, %s73_s15  }
  0x6c   : > { %s1894_s1 = sld [smem:[#allocation25_spill]]  ;;  %s291_s14 = scalar_lea.vmem [#allocation6], %s1869_s19 }
  0x6d   : > { %s299_s18 = sshll.u32 %s291_s14, 4  ;;  %p1614_p11 = pnand %p1041_p2, %p82_p4  ;;  %s1618_s18 = int_to_ptr.vmem [resolvable:$true] %s299_s18 }
  0x6f   : > { %p1186_p5 = pneg %p1614_p11 }
  0x72   : > { %s1608_s30 = scalar_lea.hbm %s1894_s1, %s1870_s12  ;;  %s1189_s14 = scalar_lea.hbm %s1894_s1, 256 }
  0x73   : > { %s1184_s11 = scalar_lea.hbm %s1608_s30, 128  ;;  %p1190_p9 = scmp.lt.u32.totalorder %s1608_s30, %s1894_s1 }
  0x74   : > { %p1185_p12 = scmp.ne.s32.totalorder %s1608_s30, %s1184_s11  ;;  %p1191_p0 = scmp.lt.u32.totalorder %s1189_s14, %s1184_s11 }
  0x75   : > { %p1193_p1 = scmp.lt.u32.totalorder %s1184_s11, %s1608_s30 }
  0x76   : > { %p1187_p13 = pnand %p1186_p5, %p1185_p12  ;;  %p1192_p3 = por %p1191_p0, %p1190_p9 }
  0x78   : > { %p1188_p7 = pneg %p1187_p13  ;;  %p1194_p2 = por %p1193_p1, %p1192_p3 }
  0x7a   : > { %p1195_p4 = pnand %p1194_p2, %p1188_p7 }
  0x7c   : > { %1198 = shalt.err (!%p1195_p4)
}
  0x7d   : > { %s1199_s15 = scalar_lea.vmem %s1618_s18, 128  ;;  %s1377_s8 = smov [#allocation6]  }
  0x7e   : > { %p1200_p6 = scmp.ne.s32.totalorder %s1618_s18, %s1199_s15  ;;  %s1204_s20 = sshll.u32 %s1377_s8, 4  ;;  %s1205_s20 = int_to_ptr.vmem [resolvable:$false] %s1204_s20 }
  0x7f   : > { %s1206_s19 = scalar_lea.vmem %s1205_s20, 256  ;;  %p1207_p13 = scmp.lt.s32.totalorder %s1618_s18, %s1205_s20 }
  0x80   : > { %p1202_p10 = pnand %p1200_p6, %p1186_p5  ;;  %p1208_p9 = scmp.lt.s32.totalorder %s1206_s19, %s1199_s15 }
  0x82   : > { %p1203_p12 = pneg %p1202_p10  ;;  %p1209_p0 = por %p1208_p9, %p1207_p13 }
  0x84   : > { %p1210_p3 = pnand %p1209_p0, %p1203_p12 }
  0x86   : > { %1213 = shalt.err (!%p1210_p3)
}
  0x87   : > { %s1896_s12 = scalar_lea.sflag [#allocation3], %s1596_s17  ;;  %s1897_s11 = sshll.u32 %s1366_s25, 7 }
  0x88   : > { %1029 = dma.hbm_to_vmem [thread:$0]  (!%p1614_p11), %s1608_s30, 128, %s1618_s18, %s1896_s12, %s1373_s27, %s1373_s27, %s1374_s28  }
  0x89   : > { %s1898_s4 = sld [smem:[#allocation28_spill]]  ;;  %s1899_s20 = sshll.u32 %s1596_s17, 3 }
  0x8a   : > { %s313_s19 = scalar_lea.vmem [#allocation10], %s1899_s20  ;;  %s310_s1 = scalar_lea.sflag [#allocation11], %s1596_s17 }
  0x8b   : > { %s321_s0 = sshll.u32 %s313_s19, 4  ;;  %s1660_s0 = int_to_ptr.vmem [resolvable:$true] %s321_s0 }
  0x8f   : > { %s1656_s8 = scalar_lea.hbm %s1898_s4, %s1897_s11  ;;  %s1219_s12 = scalar_lea.hbm %s1898_s4, 256 }
  0x90   : > { %s1214_s3 = scalar_lea.hbm %s1656_s8, 128  ;;  %p1220_p4 = scmp.lt.u32.totalorder %s1656_s8, %s1898_s4 }
  0x91   : > { %p1215_p7 = scmp.ne.s32.totalorder %s1656_s8, %s1214_s3  ;;  %p1221_p6 = scmp.lt.u32.totalorder %s1219_s12, %s1214_s3 }
  0x92   : > { %p1223_p12 = scmp.lt.u32.totalorder %s1214_s3, %s1656_s8 }
  0x93   : > { %p1217_p1 = pnand %p1215_p7, %p1186_p5  ;;  %p1222_p10 = por %p1221_p6, %p1220_p4 }
  0x95   : > { %p1218_p2 = pneg %p1217_p1  ;;  %p1224_p13 = por %p1223_p12, %p1222_p10 }
  0x97   : > { %p1225_p9 = pnand %p1224_p13, %p1218_p2 }
  0x99   : > { %1228 = shalt.err (!%p1225_p9)
}
  0x9a   : > { %s1229_s15 = scalar_lea.vmem %s1660_s0, 128  ;;  %s1378_s20 = smov [#allocation10]  }
  0x9b   : > { %p1230_p0 = scmp.ne.s32.totalorder %s1660_s0, %s1229_s15  ;;  %s1234_s19 = sshll.u32 %s1378_s20, 4  ;;  %s1235_s19 = int_to_ptr.vmem [resolvable:$false] %s1234_s19 }
  0x9c   : > { %s1236_s30 = scalar_lea.vmem %s1235_s19, 256  ;;  %p1237_p1 = scmp.lt.s32.totalorder %s1660_s0, %s1235_s19 }
  0x9d   : > { %p1232_p3 = pnand %p1230_p0, %p1186_p5  ;;  %p1238_p4 = scmp.lt.s32.totalorder %s1236_s30, %s1229_s15 }
  0x9f   : > { %p1233_p7 = pneg %p1232_p3  ;;  %p1239_p6 = por %p1238_p4, %p1237_p1 }
  0xa1   : > { %p1240_p10 = pnand %p1239_p6, %p1233_p7 }
  0xa3   : > { %1243 = shalt.err (!%p1240_p10)
}
  0xa4   : > { %1032 = dma.hbm_to_vmem [thread:$0]  (!%p1614_p11), %s1656_s8, 128, %s1660_s0, %s310_s1, %s1373_s27, %s1373_s27, %s1374_s28  }
  0xa5   : > { %p1900_p5 = scmp.ne.s32.totalorder %s1884_s10, 0 }
  0xa6   : > { %p1901_p2 = scmp.ne.s32.totalorder (!%p1900_p5), %s1879_s29, 0 }
  0xa7   : > { %333 = sbr.rel (%p1900_p5) target bundleno = 1490 (0x5d2), region = 40 }
  0xae   : > { %1325 = dma.done.wait (%p1901_p2), [#allocation5], 32  }
  0xaf   : > { %1327 = vsyncadd (%p1901_p2), [#allocation5], 4294967264  ;;  %s1698_s3 = sand.u32 1, %s1354_s22   ;;  %p1902_p11 = scmp.ne.s32.totalorder %s1881_s7, 0 }
  0xb0   : > { %s1701_s21 = sshll.u32 %s1698_s3, 3  ;;  %s340_s17 = scalar_lea.sflag [#allocation3], %s1698_s3 }
  0xb1   : > { %s1871_s0 = scalar_lea.vmem [#allocation6], %s1701_s21 }
  0xb2   : > { %1329 = dma.done.wait (%p1902_p11), %s340_s17, 128  }
  0xb3   : > { %1331 = vsyncadd (%p1902_p11), %s340_s17, 4294967168 }
  0xb4   : > { %1333 = dma.done.wait (%p1902_p11), [#allocation8], 256  }
  0xb5   : > { %1335 = vsyncadd (%p1902_p11), [#allocation8], 4294967040  ;;  %s357_s1 = scalar_lea.sflag [#allocation11], %s1698_s3  ;;  %s1715_s29 = scalar_lea.vmem [#allocation10], %s1701_s21 }
  0xb6   : > { %1337 = dma.done.wait (%p1902_p11), %s357_s1, 128  }
  0xb7   : > { %1339 = vsyncadd (%p1902_p11), %s357_s1, 4294967168 }
  0xb8   : > { %365 = sfence }
  0xb9   : > { %v402_v0 = vld [vmem:[#allocation7] sm:$0xf]  ;;  %vm404_vm0 = vcmask 261120   ;;  %v1379_v1 = vmov 0.0   ;;  %vm1380_vm1 = vmmov 0   ;;  %s452_s7 = sld [smem:[#allocation2]] }
  0xba   : > { %976 = vmatprep.subr.bf16.mxu0 %v1379_v1  ;;  %v409_v2 = vsel %vm404_vm0, %v402_v0, 0  ;;  %978 = vmatprep.mubr.msk.bf16.mxu0 %vm1380_vm1, %v1379_v1  ;;  %v401_v3 = vld [vmem:[%s1871_s0] sm:$0xf]  ;;  %s944_s10 = sld [smem:[#allocation2 + $0x80]]  ;;  %v943_v6 = vld [vmem:[%s1715_s29 + $0x4] sm:$0xf] }
  0xbb   : > { %977 = vmatpush3.bf16.xpose.msra.mxu0 %v409_v2  ;;  %982 = vmatprep.subr.bf16.mxu1 %v1379_v1  ;;  %v451_v4 = vld [vmem:[%s1715_s29] sm:$0xf]  ;;  %vm490_vm2 = vcmask 64512   ;;  %v403_v24 = vld [vmem:[#allocation9] sm:$0xf]  ;;  %vm508_vm3 = vcmask 1043456  }
  0xbc   : > { %984 = vmatprep.mubr.msk.bf16.mxu1 %vm1380_vm1, %v1379_v1  ;;  %994 = vmatprep.subr.bf16.mxu0 %v1379_v1  ;;  %v558_v25 = vld [vmem:[#allocation9 + $0x4] sm:$0xf]  ;;  %v510_v26 = vsel %vm508_vm3, %v403_v24, 0  ;;  %v556_v30 = vld [vmem:[#allocation7 + $0x4] sm:$0xf]  ;;  %vm503_vm4 = vcmask 60416  }
  0xbd   : > { %v661_v27 = vsel %vm508_vm3, %v558_v25, 0  ;;  %983 = vmatpush3.bf16.msra.mxu1 %v510_v26  ;;  %v563_v33 = vsel %vm404_vm0, %v556_v30, 0  ;;  %v605_v35 = vld [vmem:[%s1715_s29] sm:$0xf]  ;;  %v949_v37 = vld [vmem:[%s1715_s29 + $0x4] sm:$0xf] }
  0xbe   : > { %988 = vmatprep.subr.bf16.mxu1 %v1379_v1 }
  0xbf   : > { %s455_s27 = sshrl.u32 %s452_s7, 16  ;;  %p454_p12 = scmp.ne.f32.partialorder %s452_s7, %s452_s7 }
  0xc0   : > { %s473_s28 = sshrl.u32 %s944_s10, 16  ;;  %s456_s8 = sand.u32 1, %s455_s27 }
  0xc1   : > { %s474_s18 = sand.u32 1, %s473_s28  ;;  %s457_s12 = sadd.s32 32767, %s456_s8 }
  0xc2   : > { %979 = vmatmul.mubr.msk.bf16.vlgmr.msra.gmra.mrb[0].mxu0 %vm404_vm0, %v401_v3  ;;  %s475_s11 = sadd.s32 32767, %s474_s18  ;;  %s458_s14 = sadd.s32 %s457_s12, %s452_s7 }
  0xc3   : > { %996 = vmatprep.mubr.msk.bf16.mxu0 %vm1380_vm1, %v1379_v1  ;;  %s476_s15 = sadd.s32 %s944_s10, %s475_s11  ;;  %s459_s20 = sand.u32 4294901760, %s458_s14  ;;  %995 = vmatpush3.bf16.msra.mxu0 %v661_v27 }
  0xc4   : > { %p472_p13 = scmp.ne.f32.partialorder %s944_s10, %s944_s10  ;;  %s477_s19 = sand.u32 4294901760, %s476_s15 }
  0xc5   : > { %s1917_s20 = smov (%p454_p12, %s459_s20), 2143289344  ;;  %s950_s7 = sld [smem:[#allocation2 + $0x81]] }
  0xc6   : > { %s1919_s19 = smov (%p472_p13, %s477_s19), 2143289344  ;;  %s462_s30 = sshrl.u32 %s1917_s20, 16 }
  0xc7   : > { %s480_s17 = sshrl.u32 %s1919_s19, 16  ;;  %s463_s1 = sshll.u32 %s462_s30, 16 }
  0xc8   : > { %s481_s0 = sshll.u32 %s480_s17, 16  ;;  %s464_s4 = sor.u32 %s463_s1, %s462_s30 }
  0xc9   : > { %s482_s13 = sor.u32 %s481_s0, %s480_s17  ;;  %v465_v5 = vstv %s464_s4  ;;  %s1742_s4 = scalar_lea.vmem [#allocation13], %s1701_s21 }
  0xca   : > { %v483_v7 = vstv %s482_s13  ;;  %v467_v8 = vmul.bf16 %v465_v5, %v451_v4  ;;  %s1903_s13 = scalar_lea.vmem [#allocation6], %s1701_s21  ;;  %s948_s0 = sld [smem:[#allocation2 + $0x1]] }
  0xcb   : > { %v485_v9 = vmul.bf16 %v943_v6, %v483_v7  ;;  %v946_v34 = vld [vmem:[%s1903_s13 + $0x4] sm:$0xf]  ;;  %s626_s27 = sshrl.u32 %s950_s7, 16  ;;  %p625_p0 = scmp.ne.f32.partialorder %s950_s7, %s950_s7 }
  0xcc   : > { %s627_s8 = sand.u32 1, %s626_s27  ;;  %s742_s29 = sshll.u32 %s1742_s4, 4  ;;  %s1770_s29 = int_to_ptr.vmem [resolvable:$true] %s742_s29 }
  0xcd   : > { %v486_v10 = vadd.bf16 %v485_v9, %v467_v8  ;;  %s628_s12 = sadd.s32 32767, %s627_s8  ;;  %s711_s8 = scalar_lea.sflag [#allocation14], %s1698_s3 }
  0xce   : > { %s629_s14 = sadd.s32 %s950_s7, %s628_s12  ;;  %s1381_s12 = smov [#allocation13]  }
  0xcf   : > { %v487_v11 = vunpack.c.l.bf16 %v486_v10  ;;  %s630_s21 = sand.u32 4294901760, %s629_s14 }
  0xd0   : > { %s609_s10 = sshrl.u32 %s948_s0, 16  ;;  %p608_p9 = scmp.ne.f32.partialorder %s948_s0, %s948_s0 }
  0xd1   : > { %v488_v12 = vadd.f32 0.17677669, %v487_v11  ;;  %s610_s28 = sand.u32 1, %s609_s10  ;;  %s1923_s21 = smov (%p625_p0, %s630_s21), 2143289344 }
  0xd2   : > { %s611_s18 = sadd.s32 32767, %s610_s28  ;;  %s633_s19 = sshrl.u32 %s1923_s21, 16 }
  0xd3   : > { %s612_s11 = sadd.s32 %s948_s0, %s611_s18  ;;  %s634_s17 = sshll.u32 %s633_s19, 16 }
  0xd4   : > { %s613_s15 = sand.u32 4294901760, %s612_s11  ;;  %s635_s13 = sor.u32 %s634_s17, %s633_s19 }
  0xd5   : > { %s1921_s15 = smov (%p608_p9, %s613_s15), 2143289344  ;;  %v636_v38 = vstv %s635_s13  ;;  %s940_s10 = sshll.u32 %s1698_s3, 4 }
  0xd6   : > { %s616_s20 = sshrl.u32 %s1921_s15, 16  ;;  %v638_v40 = vmul.bf16 %v949_v37, %v636_v38  ;;  %s1754_s0 = scalar_lea.vmem [#allocation12], %s940_s10 }
  0xd7   : > { %s617_s30 = sshll.u32 %s616_s20, 16  ;;  %s1768_s28 = scalar_lea.hbm %s1860_s6, %s1477_s9 }
  0xd8   : > { %s618_s1 = sor.u32 %s617_s30, %s616_s20  ;;  %s1244_s18 = scalar_lea.vmem %s1770_s29, 128 }
  0xd9   : > { %v619_v36 = vstv %s618_s1  ;;  %p1245_p3 = scmp.ne.s32.totalorder %s1770_s29, %s1244_s18  ;;  %s1248_s11 = sshll.u32 %s1381_s12, 4  ;;  %s1249_s11 = int_to_ptr.vmem [resolvable:$false] %s1248_s11 }
  0xda   : > { %v621_v39 = vmul.bf16 %v619_v36, %v605_v35  ;;  %p1251_p4 = scmp.lt.s32.totalorder %s1770_s29, %s1249_s11 }
  0xdb   : > { %p1246_p7 = pnand %p1245_p3, %p1589_p8 }
  0xdc   : > { %v639_v41 = vadd.bf16 %v638_v40, %v621_v39 }
  0xdd   : > { %p1247_p1 = pneg %p1246_p7 }
  0xde   : > { %v640_v44 = vunpack.c.l.bf16 %v639_v41 }
  0xe0   : > { %v641_v47 = vadd.f32 0.17677669, %v640_v44 }
 0x195   : > { %v445_v13 = vpop.f32.mrb[0].mxu0 }
 0x196   : > { %v489_v14 = vmul.f32 %v488_v12, %v445_v13  ;;  %v980_v15 = vpop.f32.mrb[1].mxu0 }
 0x197   : > { %v448_v16 = vpop.f32.mrb[2].mxu0 }
 0x198   : > { %v981_v17 = vpop.f32.mrb[3].mxu0  ;;  %v491_v18 = vsel %vm490_vm2, %v489_v14, -inf }
 0x199   : > { %492 = vmax.xlane.f32.xlu0 %v491_v18 }
 0x226   : > { %v493_v19 = vpop.xlane.xlu0 %492 }
 0x227   : > { %v494_v20 = vsub.f32 %v489_v14, %v493_v19 }
 0x229   : > { %v495_v21 = vmul.f32 1.442695, %v494_v20 }
 0x22b   : > { %1103 = vpow2.f32 %v495_v21 }
 0x235   : > { %v1104_v22 = vpop.eup %1103 }
 0x236   : > { %v497_v23 = vsel %vm490_vm2, %v1104_v22, 0.0 }
 0x237   : > { %498 = vadd.xlane.f32.xlu0 %v497_v23 }
 0x2c4   : > { %v499_v28 = vpop.xlane.xlu0 %498 }
 0x2c5   : > { %1105 = vrcp.f32 %v499_v28 }
 0x2cf   : > { %v1106_v29 = vpop.eup %1105 }
 0x2d0   : > { %v501_v31 = vmul.f32 %v1106_v29, %v1104_v22 }
 0x2d2   : > { %v502_v32 = vpack.c.bf16 %v501_v31, %v501_v31 }
 0x2d4   : > { %985 = vmatmul.mubr.msk.bf16.vlgmr.msra.gmra.mrb[0].mxu1 %vm490_vm2, %v502_v32  ;;  %504 = vst.msk [vmem:[%s1742_s4] sm:$0xf] %vm503_vm4, %v502_v32 }
 0x2d5   : > { %989 = vmatpush3.bf16.xpose.msra.mxu1 %v563_v33  ;;  %990 = vmatprep.mubr.msk.bf16.mxu1 %vm1380_vm1, %v1379_v1 }
 0x2dc   : > { %991 = vmatmul.mubr.msk.bf16.vlgmr.msra.gmra.mrb[4].mxu1 %vm404_vm0, %v946_v34 }
 0x3a7   : > { %v546_v42 = vpop.f32.mrb[0].mxu1 }
 0x3a8   : > { %552 = vst.msk [vmem:[%s1754_s0] sm:$0xff] %vm404_vm0, %v546_v42  ;;  %v986_v43 = vpop.f32.mrb[1].mxu1 }
 0x3a9   : > { %v549_v45 = vpop.f32.mrb[2].mxu1 }
 0x3aa   : > { %v987_v46 = vpop.f32.mrb[3].mxu1 }
 0x3af   : > { %v599_v48 = vpop.f32.mrb[4].mxu1 }
 0x3b0   : > { %v642_v49 = vmul.f32 %v641_v47, %v599_v48  ;;  %v992_v50 = vpop.f32.mrb[5].mxu1 }
 0x3b1   : > { %v602_v51 = vpop.f32.mrb[6].mxu1 }
 0x3b2   : > { %v993_v52 = vpop.f32.mrb[7].mxu1  ;;  %v643_v53 = vsel %vm490_vm2, %v642_v49, -inf }
 0x3b3   : > { %644 = vmax.xlane.f32.xlu1 %v643_v53 }
 0x440   : > { %v645_v54 = vpop.xlane.xlu1 %644 }
 0x441   : > { %v646_v55 = vsub.f32 %v642_v49, %v645_v54 }
 0x443   : > { %v647_v56 = vmul.f32 1.442695, %v646_v55 }
 0x445   : > { %1107 = vpow2.f32 %v647_v56 }
 0x44f   : > { %v1108_v57 = vpop.eup %1107 }
 0x450   : > { %v649_v58 = vsel %vm490_vm2, %v1108_v57, 0.0 }
 0x451   : > { %650 = vadd.xlane.f32.xlu1 %v649_v58 }
 0x4de   : > { %v651_v59 = vpop.xlane.xlu1 %650 }
 0x4df   : > { %1109 = vrcp.f32 %v651_v59 }
 0x4e9   : > { %v1110_v60 = vpop.eup %1109 }
 0x4ea   : > { %v653_v61 = vmul.f32 %v1110_v60, %v1108_v57 }
 0x4ec   : > { %v654_v62 = vpack.c.bf16 %v653_v61, %v653_v61 }
 0x4ee   : > { %997 = vmatmul.mubr.msk.bf16.vlgmr.msra.gmra.mrb[4].mxu0 %vm490_vm2, %v654_v62  ;;  %951 = vst.msk [vmem:[%s1742_s4 + $0x4] sm:$0xf] %vm503_vm4, %v654_v62  ;;  %s1250_s4 = scalar_lea.vmem %s1249_s11, 256 }
 0x4ef   : > { %p1252_p6 = scmp.lt.s32.totalorder %s1250_s4, %s1244_s18 }
 0x4f1   : > { %p1253_p10 = por %p1252_p6, %p1251_p4 }
 0x4f3   : > { %p1254_p5 = pnand %p1253_p10, %p1247_p1 }
 0x4f5   : > { %1257 = shalt.err (!%p1254_p5)
}
 0x4f6   : > { %s1258_s9 = scalar_lea.hbm %s1768_s28, 128  ;;  %s1262_s21 = scalar_lea.hbm %s1860_s6, 256 }
 0x4f7   : > { %p1259_p2 = scmp.ne.s32.totalorder %s1768_s28, %s1258_s9  ;;  %p1263_p13 = scmp.lt.u32.totalorder %s1768_s28, %s1860_s6 }
 0x4f8   : > { %p1264_p9 = scmp.lt.u32.totalorder %s1262_s21, %s1258_s9  ;;  %p1266_p3 = scmp.lt.u32.totalorder %s1258_s9, %s1768_s28 }
 0x4f9   : > { %p1260_p11 = pnand %p1259_p2, %p1589_p8 }
 0x4fa   : > { %p1265_p0 = por %p1264_p9, %p1263_p13 }
 0x4fb   : > { %p1261_p12 = pneg %p1260_p11 }
 0x4fc   : > { %p1267_p7 = por %p1266_p3, %p1265_p0 }
 0x4fe   : > { %p1268_p1 = pnand %p1267_p7, %p1261_p12 }
 0x500   : > { %1271 = shalt.err (!%p1268_p1)
}
 0x501   : > { %s1382_s30 = smov 64   ;;  %s1383_s17 = smov 4  }
 0x502   : > { %1013 = dma.vmem_to_hbm [thread:$0]  (%p1589_p8), %s1770_s29, 128, %s1768_s28, %s711_s8, %s1382_s30, %s1382_s30, %s1383_s17  }
 0x503   : > { %s725_s1 = sshll.u32 %s1754_s0, 4  ;;  %s966_s13 = sshll.u32 %s1362_s24, 8  ;;  %s1798_s1 = int_to_ptr.vmem [resolvable:$true] %s725_s1 }
 0x504   : > { %s1803_s27 = scalar_lea.hbm %s1859_s5, %s966_s13  ;;  %s706_s18 = scalar_lea.sflag [#allocation4], %s1698_s3 }
 0x505   : > { %s1272_s12 = scalar_lea.vmem %s1798_s1, 256  ;;  %s1384_s24 = smov [#allocation12]  }
 0x506   : > { %p1273_p4 = scmp.ne.s32.totalorder %s1798_s1, %s1272_s12  ;;  %s1276_s29 = sshll.u32 %s1384_s24, 4  ;;  %s1277_s29 = int_to_ptr.vmem [resolvable:$false] %s1276_s29 }
 0x507   : > { %s1278_s28 = scalar_lea.vmem %s1277_s29, 512  ;;  %p1279_p5 = scmp.lt.s32.totalorder %s1798_s1, %s1277_s29 }
 0x508   : > { %p1274_p6 = pnand %p1273_p4, %p1589_p8  ;;  %p1280_p2 = scmp.lt.s32.totalorder %s1278_s28, %s1272_s12 }
 0x50a   : > { %p1275_p10 = pneg %p1274_p6  ;;  %p1281_p11 = por %p1280_p2, %p1279_p5 }
 0x50c   : > { %p1282_p12 = pnand %p1281_p11, %p1275_p10 }
 0x5c1   : > { %v697_v63 = vpop.f32.mrb[4].mxu0 }
 0x5c2   : > { %953 = vst.msk [vmem:[%s1754_s0 + $0x8] sm:$0xff] %vm404_vm0, %v697_v63  ;;  %v998_v0 = vpop.f32.mrb[5].mxu0 }
 0x5c3   : > { %v700_v1 = vpop.f32.mrb[6].mxu0 }
 0x5c4   : > { %1285 = shalt.err (!%p1282_p12)
}
 0x5c5   : > { %s1286_s0 = scalar_lea.hbm %s1803_s27, 256  ;;  %s1290_s4 = scalar_lea.hbm %s1859_s5, 512 }
 0x5c6   : > { %p1287_p13 = scmp.ne.s32.totalorder %s1803_s27, %s1286_s0  ;;  %p1291_p3 = scmp.lt.u32.totalorder %s1803_s27, %s1859_s5 }
 0x5c7   : > { %p1292_p7 = scmp.lt.u32.totalorder %s1290_s4, %s1286_s0  ;;  %p1294_p4 = scmp.lt.u32.totalorder %s1286_s0, %s1803_s27 }
 0x5c8   : > { %p1288_p9 = pnand %p1287_p13, %p1589_p8 }
 0x5c9   : > { %p1293_p1 = por %p1292_p7, %p1291_p3 }
 0x5ca   : > { %p1289_p0 = pneg %p1288_p9 }
 0x5cb   : > { %p1295_p6 = por %p1294_p4, %p1293_p1 }
 0x5cd   : > { %p1296_p10 = pnand %p1295_p6, %p1289_p0 }
 0x5cf   : > { %1299 = shalt.err (!%p1296_p10)
}
 0x5d0   : > { %s1385_s15 = smov 128   ;;  %s1386_s21 = smov 8   ;;  %v999_v2 = vpop.f32.mrb[7].mxu0 }
 0x5d1   : > { %1012 = dma.vmem_to_hbm [thread:$0]  (%p1589_p8), %s1798_s1, 256, %s1803_s27, %s706_s18, %s1385_s15, %s1385_s15, %s1386_s21  }
 0x5d2 PF: > { %s1904_s20 = sld [smem:[#allocation21_spill]]  ;;  %s1905_s19 = sld [smem:[#allocation22_spill]] }
 0x5d3   : > { %p1907_p2 = scmp.ge.s32.totalorder %s1370_s26, 2 }
 0x5d8   : > { %s757_s30 = sand.u32 1, %s1904_s20   ;;  %p1906_p5 = scmp.ne.s32.totalorder %s1905_s19, 0 }
 0x5d9   : > { %s758_s17 = scalar_lea.sflag [#allocation4], %s757_s30 }
 0x5da   : > { %p1034_p11 = pnand %p1907_p2, %p1906_p5 }
 0x5dc   : > { %1341 = dma.done.wait (!%p1034_p11), %s758_s17, 256  }
 0x5dd   : > { %1343 = vsyncadd (!%p1034_p11), %s758_s17, 4294967040  ;;  %s767_s13 = scalar_lea.sflag [#allocation14], %s757_s30 }
 0x5de   : > { %1345 = dma.done.wait (!%p1034_p11), %s767_s13, 128  }
 0x5df   : > { %1347 = vsyncadd (!%p1034_p11), %s767_s13, 4294967168  ;;  %s31_s26 = sadd.s32 1, %s1370_s26   ;;  %s1908_s16 = sld [smem:[#allocation23_spill]] }
 0x5e0   : > { %p28_p12 = scmp.ge.s32.totalorder %s31_s26, 4   ;;  %s1909_s21 = smov %s1354_s22 }
 0x5e1   : > { %s1910_s22 = smov %s1358_s23  ;;  %s1911_s23 = smov %s1601_s2 }
 0x5e2   : > { %s1912_s24 = smov %s1366_s25  ;;  %30 = sbr.rel (!%p28_p12) target bundleno = 18 (0x12), region = 136 }
 0x5e5   : > { %s1913_s25 = smov %s1908_s16 }
 0x5e9   :  { %772 = vsyncpa [#allocation3], 1 }
 0x5ea   :  { %774 = vsyncpa [#allocation3 + $0x1], 1 }
 0x5eb   :  { %775 = vsyncpa [#allocation8], 1 }
 0x5ec   :  { %776 = vsyncpa [#allocation11], 1 }
 0x5ed   :  { %778 = vsyncpa [#allocation11 + $0x1], 1 }
 0x5ee   :  { %779 = vsyncpa [#allocation4], 1 }
 0x5ef   :  { %781 = vsyncpa [#allocation4 + $0x1], 1 }
 0x5f0   :  { %782 = vsyncpa [#allocation14], 1 }
 0x5f1   :  { %784 = vsyncpa [#allocation14 + $0x1], 1 }
 0x5f2   :  { %785 = vsyncpa [#allocation5], 1 }
 0x5f3   :  { %787 = vsyncpa [#allocation5 + $0x1], 1 }

</bundles_post_ra>
